<compile_context>
chip_gen: v7x
topology: tpu7x:2x2x1
jax: 0.10.0
libtpu: 0.0.40
codegen_flags: <defaults>
</compile_context>

<pallas_src>
import functools

import jax
import jax.numpy as jnp
from jax.experimental import pallas as pl
from jax.experimental.pallas import tpu as pltpu


def _phase_shuffle_kernel(x_ref, off_ref, o_ref, *, n):
    # x_ref  : (R, L)        rows = flattened (batch, channel); L on lanes
    # off_ref: (R, 1) int32  per-row phase offset in [-n, n]
    # o_ref  : (R, L)
    x = x_ref[...]
    R, L = x.shape

    lane = jax.lax.broadcasted_iota(jnp.int32, (R, L), 1)
    # Hoisted: a single lane-broadcast of the offset column, reused by all
    # 2n compares below (avoids 2n repeated broadcast_in_dim of off).
    offb = jnp.broadcast_to(off_ref[...], (R, L))

    # out[r, j] = xp[r, off[r] + n + j] with xp = reflect_pad(x, n).
    # Offsets outside [-n, n] fall through to the identity branch (callers
    # draw them from randint(-n, n+1); could be pl.debug_check'ed if needed).
    out = x                                              # off == 0 case
    for v in range(1, n + 1):
        # ---- offset +v: interior out[j] = x[j+v]; right edge reflects ----
        # pltpu.roll == jnp.roll (non-negative shift): roll by L-v == shift
        # left by v, so lane j holds x[(j+v) mod L].
        cand = pltpu.roll(x, shift=L - v, axis=1)
        for t in range(v):
            # lane L-v+t must hold the reflected right edge x[:, L-2-t]
            cand = jnp.where(lane == L - v + t, x[:, L - 2 - t:L - 1 - t], cand)
        out = jnp.where(offb == v, cand, out)

        # ---- offset -v: interior out[j] = x[j-v]; left edge reflects -----
        cand = pltpu.roll(x, shift=v, axis=1)            # lane j holds x[(j-v) mod L]
        for t in range(v):
            # lane t must hold the reflected left edge x[:, v-t]
            cand = jnp.where(lane == t, x[:, v - t:v - t + 1], cand)
        out = jnp.where(offb == -v, cand, out)

    o_ref[...] = out.astype(o_ref.dtype)


def phase_shuffle_apply(x, offsets, n, *, donate_input=False):
    """x: (B, C, L); offsets: (B, C) int32 in [-n, n] -> (B, C, L)."""
    B, C, L = x.shape
    if n == 0:
        return x
    assert L > n, "reflect padding requires length > n"

    R = B * C
    x2 = x.reshape(R, L)                          # free (contiguous) reshape
    off2 = offsets.reshape(R, 1).astype(jnp.int32)

    itemsize = jnp.dtype(x.dtype).itemsize
    sub = max(8, 32 // itemsize)                  # sublane packing per dtype

    try:
        vmem_cap = int(getattr(pltpu.get_tpu_info(), "vmem_capacity_bytes"))
    except Exception:
        vmem_cap = 64 * 1024 * 1024               # v7x per-TC (most restrictive)

    # Row tile: ~2 MiB of input per block (measured mem-bound kernels reach
    # >=85% of HBM roofline at >=1 MiB blocks), clamped so double-buffered
    # in/out blocks plus the select chain's compiler-managed block-sized
    # temporaries stay within ~half of physical VMEM.
    row_bytes = L * itemsize
    target_rows = max(sub, (2 * 1024 * 1024) // row_bytes)
    vmem_rows = max(sub, (vmem_cap // 2) // (12 * row_bytes))
    if R <= sub:
        rt = R
    else:
        rt = max(sub, (min(target_rows, vmem_rows, R) // sub) * sub)
    grid = pl.cdiv(R, rt)
    # NOTE: when R % rt != 0 the tail block's DMA covers rows past R; their
    # contents (including offsets) are unspecified, but the kernel is purely
    # row-independent and those rows are never written back, so this is
    # harmless by construction (do not turn this into real OOB indexing).

    blk_bytes = rt * L * itemsize
    # 2x double-buffered input + 2x output blocks + headroom for block-sized
    # elementwise temporaries; never below the default scoped limit, never
    # above ~3/4 of physical VMEM (matters on the 64 MiB v7x part).
    vmem_limit = int(min(max(16 * blk_bytes + (2 << 20), 32 << 20),
                         (vmem_cap * 3) // 4))

    out = pl.pallas_call(
        functools.partial(_phase_shuffle_kernel, n=n),
        out_shape=jax.ShapeDtypeStruct((R, L), x.dtype),
        grid_spec=pltpu.PrefetchScalarGridSpec(
            num_scalar_prefetch=0,
            grid=(grid,),
            in_specs=[
                pl.BlockSpec((rt, L), lambda i: (i, 0)),
                pl.BlockSpec((rt, 1), lambda i: (i, 0)),
            ],
            out_specs=pl.BlockSpec((rt, L), lambda i: (i, 0)),
        ),
        compiler_params=pltpu.CompilerParams(
            dimension_semantics=("parallel",),
            vmem_limit_bytes=vmem_limit,
        ),
        # Input and output share shape/dtype and 1:1 block maps, so the
        # output may reuse x's HBM buffer when the caller donates it.
        input_output_aliases={0: 0} if donate_input else {},
    )(x2, off2)
    return out.reshape(B, C, L)


def phase_shuffle(x, key, n):
    """Full module forward: draw per-(batch, channel) offsets, then shuffle."""
    # TODO(synk): torch.randint RNG stream replaced by jax.random with an
    # explicit key (identical distribution: uniform integers in [-n, n]).
    B, C, _ = x.shape
    offsets = jax.random.randint(key, (B, C), -n, n + 1, dtype=jnp.int32)
    return phase_shuffle_apply(x, offsets, n)


def _phase_shuffle_ref(x, offsets, n):
    """Pure-JAX reference mirroring the PyTorch module exactly."""
    B, C, L = x.shape
    idx = offsets[:, :, None] + jnp.arange(n, n + L, dtype=jnp.int32)[None, None, :]
    xp = jnp.pad(x, ((0, 0), (0, 0), (n, n)), mode="reflect")
    return jnp.take_along_axis(xp, idx, axis=2)


if __name__ == "__main__":
    root = jax.random.PRNGKey(0)
    kx, koff, kx2, koff2, kmod = jax.random.split(root, 5)

    # Small, aligned case: (B, C, L) = (2, 8, 256), n = 2.
    B, C, L, N = 2, 8, 256, 2
    x = jax.random.normal(kx, (B, C, L), dtype=jnp.float32)
    offsets = jax.random.randint(koff, (B, C), -N, N + 1, dtype=jnp.int32)
    out = jax.block_until_ready(phase_shuffle_apply(x, offsets, N))
    assert out.shape == (B, C, L), out.shape
    assert jnp.array_equal(out, _phase_shuffle_ref(x, offsets, N)), \
        "Pallas PhaseShuffle != reference"

    # Row count not a multiple of the tile (exercises the harmless tail block).
    B2, C2, L2 = 3, 7, 256
    x2 = jax.random.normal(kx2, (B2, C2, L2), dtype=jnp.float32)
    offsets2 = jax.random.randint(koff2, (B2, C2), -N, N + 1, dtype=jnp.int32)
    out2 = jax.block_until_ready(phase_shuffle_apply(x2, offsets2, N))
    assert jnp.array_equal(out2, _phase_shuffle_ref(x2, offsets2, N)), \
        "Pallas PhaseShuffle != reference (tail block)"

    # Module-style entry point (internal RNG) exercised once as well.
    out3 = jax.block_until_ready(phase_shuffle(x, kmod, N))
    assert out3.shape == (B, C, L)

    print("KERNEL_OK")
</pallas_src>

<mosaic_0001>
module attributes {stable_mosaic.version = 11 : i64} {
  func.func @_phase_shuffle_kernel(%arg0: i32, %arg1: memref<16x256xf32, #tpu.memory_space<vmem>>, %arg2: memref<16x1xi32, #tpu.memory_space<vmem>>, %arg3: memref<16x256xf32, #tpu.memory_space<vmem>>) attributes {dimension_semantics = [#tpu.dimension_semantics<parallel>], iteration_bounds = array<i64: 1>, scalar_prefetch = 0 : i64, scratch_operands = 0 : i64, tpu.core_type = #tpu.core_type<tc>, window_params = [{transform_indices = @transform_0, window_bounds = array<i64: 16, 256>}, {transform_indices = @transform_1, window_bounds = array<i64: 16, 1>}, {transform_indices = @transform_2, window_bounds = array<i64: 16, 256>}]} {
    %c0 = arith.constant 0 : index
    %c0_0 = arith.constant 0 : index
    %0 = vector.load %arg1[%c0, %c0_0] : memref<16x256xf32, #tpu.memory_space<vmem>>, vector<16x256xf32>
    %1 = tpu.iota {dimensions = array<i32: 1>} : vector<16x256xi32>
    %c0_1 = arith.constant 0 : index
    %c0_2 = arith.constant 0 : index
    %2 = vector.load %arg2[%c0_1, %c0_2] : memref<16x1xi32, #tpu.memory_space<vmem>>, vector<16x1xi32>
    %3 = vector.shape_cast %2 : vector<16x1xi32> to vector<16x1xi32>
    %4 = vector.broadcast %3 : vector<16x1xi32> to vector<16x256xi32>
    %c255_i32 = arith.constant 255 : i32
    %5 = tpu.dynamic_rotate %0 by %c255_i32 dim 1 : vector<16x256xf32>, i32 -> vector<16x256xf32>
    %c255_i32_3 = arith.constant 255 : i32
    %6 = vector.broadcast %c255_i32_3 : i32 to vector<16x256xi32>
    %7 = arith.cmpi eq, %1, %6 : vector<16x256xi32>
    %8 = vector.extract_strided_slice %0 {offsets = [0, 254], sizes = [16, 1], strides = [1, 1]} : vector<16x256xf32> to vector<16x1xf32>
    %9 = vector.shape_cast %8 : vector<16x1xf32> to vector<16x1xf32>
    %10 = vector.broadcast %9 : vector<16x1xf32> to vector<16x256xf32>
    %11 = arith.select %7, %10, %5 : vector<16x256xi1>, vector<16x256xf32>
    %c1_i32 = arith.constant 1 : i32
    %12 = vector.broadcast %c1_i32 : i32 to vector<16x256xi32>
    %13 = arith.cmpi eq, %4, %12 : vector<16x256xi32>
    %14 = arith.select %13, %11, %0 : vector<16x256xi1>, vector<16x256xf32>
    %c1_i32_4 = arith.constant 1 : i32
    %15 = tpu.dynamic_rotate %0 by %c1_i32_4 dim 1 : vector<16x256xf32>, i32 -> vector<16x256xf32>
    %c0_i32 = arith.constant 0 : i32
    %16 = vector.broadcast %c0_i32 : i32 to vector<16x256xi32>
    %17 = arith.cmpi eq, %1, %16 : vector<16x256xi32>
    %18 = vector.extract_strided_slice %0 {offsets = [0, 1], sizes = [16, 1], strides = [1, 1]} : vector<16x256xf32> to vector<16x1xf32>
    %19 = vector.shape_cast %18 : vector<16x1xf32> to vector<16x1xf32>
    %20 = vector.broadcast %19 : vector<16x1xf32> to vector<16x256xf32>
    %21 = arith.select %17, %20, %15 : vector<16x256xi1>, vector<16x256xf32>
    %c-1_i32 = arith.constant -1 : i32
    %22 = vector.broadcast %c-1_i32 : i32 to vector<16x256xi32>
    %23 = arith.cmpi eq, %4, %22 : vector<16x256xi32>
    %24 = arith.select %23, %21, %14 : vector<16x256xi1>, vector<16x256xf32>
    %c254_i32 = arith.constant 254 : i32
    %25 = tpu.dynamic_rotate %0 by %c254_i32 dim 1 : vector<16x256xf32>, i32 -> vector<16x256xf32>
    %c254_i32_5 = arith.constant 254 : i32
    %26 = vector.broadcast %c254_i32_5 : i32 to vector<16x256xi32>
    %27 = arith.cmpi eq, %1, %26 : vector<16x256xi32>
    %28 = vector.extract_strided_slice %0 {offsets = [0, 254], sizes = [16, 1], strides = [1, 1]} : vector<16x256xf32> to vector<16x1xf32>
    %29 = vector.shape_cast %28 : vector<16x1xf32> to vector<16x1xf32>
    %30 = vector.broadcast %29 : vector<16x1xf32> to vector<16x256xf32>
    %31 = arith.select %27, %30, %25 : vector<16x256xi1>, vector<16x256xf32>
    %c255_i32_6 = arith.constant 255 : i32
    %32 = vector.broadcast %c255_i32_6 : i32 to vector<16x256xi32>
    %33 = arith.cmpi eq, %1, %32 : vector<16x256xi32>
    %34 = vector.extract_strided_slice %0 {offsets = [0, 253], sizes = [16, 1], strides = [1, 1]} : vector<16x256xf32> to vector<16x1xf32>
    %35 = vector.shape_cast %34 : vector<16x1xf32> to vector<16x1xf32>
    %36 = vector.broadcast %35 : vector<16x1xf32> to vector<16x256xf32>
    %37 = arith.select %33, %36, %31 : vector<16x256xi1>, vector<16x256xf32>
    %c2_i32 = arith.constant 2 : i32
    %38 = vector.broadcast %c2_i32 : i32 to vector<16x256xi32>
    %39 = arith.cmpi eq, %4, %38 : vector<16x256xi32>
    %40 = arith.select %39, %37, %24 : vector<16x256xi1>, vector<16x256xf32>
    %c2_i32_7 = arith.constant 2 : i32
    %41 = tpu.dynamic_rotate %0 by %c2_i32_7 dim 1 : vector<16x256xf32>, i32 -> vector<16x256xf32>
    %c0_i32_8 = arith.constant 0 : i32
    %42 = vector.broadcast %c0_i32_8 : i32 to vector<16x256xi32>
    %43 = arith.cmpi eq, %1, %42 : vector<16x256xi32>
    %44 = vector.extract_strided_slice %0 {offsets = [0, 2], sizes = [16, 1], strides = [1, 1]} : vector<16x256xf32> to vector<16x1xf32>
    %45 = vector.shape_cast %44 : vector<16x1xf32> to vector<16x1xf32>
    %46 = vector.broadcast %45 : vector<16x1xf32> to vector<16x256xf32>
    %47 = arith.select %43, %46, %41 : vector<16x256xi1>, vector<16x256xf32>
    %c1_i32_9 = arith.constant 1 : i32
    %48 = vector.broadcast %c1_i32_9 : i32 to vector<16x256xi32>
    %49 = arith.cmpi eq, %1, %48 : vector<16x256xi32>
    %50 = vector.extract_strided_slice %0 {offsets = [0, 1], sizes = [16, 1], strides = [1, 1]} : vector<16x256xf32> to vector<16x1xf32>
    %51 = vector.shape_cast %50 : vector<16x1xf32> to vector<16x1xf32>
    %52 = vector.broadcast %51 : vector<16x1xf32> to vector<16x256xf32>
    %53 = arith.select %49, %52, %47 : vector<16x256xi1>, vector<16x256xf32>
    %c-2_i32 = arith.constant -2 : i32
    %54 = vector.broadcast %c-2_i32 : i32 to vector<16x256xi32>
    %55 = arith.cmpi eq, %4, %54 : vector<16x256xi32>
    %56 = arith.select %55, %53, %40 : vector<16x256xi1>, vector<16x256xf32>
    %c0_10 = arith.constant 0 : index
    %c0_11 = arith.constant 0 : index
    %57 = vector.load %arg3[%c0_10, %c0_11] : memref<16x256xf32, #tpu.memory_space<vmem>>, vector<16x256xf32>
    tpu.vector_store %arg3[%c0_10, %c0_11], %56 {strides = array<i32>} : memref<16x256xf32, #tpu.memory_space<vmem>>, vector<16x256xf32>,
    return
  }
  func.func @transform_0(%arg0: i32) -> (i32, i32) {
    %c0_i32 = arith.constant 0 : i32
    %c0_i32_0 = arith.constant 0 : i32
    return %arg0, %c0_i32 : i32, i32
  }
  func.func @transform_1(%arg0: i32) -> (i32, i32) {
    %c0_i32 = arith.constant 0 : i32
    %c0_i32_0 = arith.constant 0 : i32
    return %arg0, %c0_i32 : i32, i32
  }
  func.func @transform_2(%arg0: i32) -> (i32, i32) {
    %c0_i32 = arith.constant 0 : i32
    %c0_i32_0 = arith.constant 0 : i32
    return %arg0, %c0_i32 : i32, i32
  }
}

</mosaic_0001>

<bundles_post_ra>
// kernel: tpu_custom_call.1
= control target key start
LH: loop header
LB: loop body
LE: loop exit
PB: predicated region body
PF: predicated region fallthrough
CT: control target
= control target key end

     0   :  { %7 = vsyncpa [#allocation3], 0  ;;  %s472_s0 = inlined_call_operand.hbm [shape: f32[16,256], index: 0, kind: input, shape index: {}]   ;;  %s473_s1 = inlined_call_operand.vmem [shape: s32[16,1], index: 1, kind: input, shape index: {}]   ;;  %s474_s2 = inlined_call_operand.hbm [shape: f32[16,256], index: 2, kind: output, shape index: {}]  }
   0x1   :  { %8 = vsyncpa [#allocation4], 0  ;;  %s275_s9 = smov [#allocation2]   ;;  %s227_s13 = scalar_lea.hbm %s472_s0, 512 }
   0x2   :  { %s14_s10 = sshll.u32 %s275_s9, 4  ;;  %p228_p0 = scmp.ne.s32.totalorder %s472_s0, %s227_s13  ;;  %s15_s10 = int_to_ptr.vmem [resolvable:$true] %s14_s10 }
   0x3   :  { %p231_p1 = scmp.lt.u32.totalorder %s227_s13, %s472_s0 }
   0x5   :  { %p233_p2 = pnand %p231_p1, %p228_p0 }
   0x7   :  { %236 = shalt.err (!%p233_p2)
}
   0x8   :  { %s237_s18 = scalar_lea.vmem %s15_s10, 512  ;;  %p242_p4 = scmp.lt.s32.totalorder %s15_s10, %s15_s10 }
   0x9   :  { %p238_p3 = scmp.ne.s32.totalorder %s15_s10, %s237_s18  ;;  %p243_p5 = scmp.lt.s32.totalorder %s237_s18, %s237_s18 }
   0xb   :  { %p244_p6 = por %p243_p5, %p242_p4 }
   0xd   :  { %p245_p7 = pnand %p244_p6, %p238_p3 }
   0xf   :  { %248 = shalt.err (!%p245_p7)
}
  0x10   :  { %s276_s19 = smov 256   ;;  %s277_s20 = smov 16  }
  0x11   :  { %20 = dma.hbm_to_vmem [thread:$0]  %s472_s0, 512, %s15_s10, [#allocation3], %s276_s19, %s276_s19, %s277_s20  }
  0x12   :  { %271 = dma.done.wait [#allocation3], 512  }
  0x13   :  { %272 = vsyncadd [#allocation3], 4294966784  ;;  %v278_v0 = vmov 126   ;;  %v279_v1 = vmov 0   ;;  %v33_v2 = vld [vmem:[%s473_s1] sm:$0xff]  ;;  %v321_v3 = vld [vmem:[#allocation2 + $0x8] sm:$0xff]  ;;  %v30_v24 = vlaneseq }
  0x14   :  { %220 = vset.pattern.permute.xlu1 %v278_v0  ;;  %219 = vset.pattern.permute.xlu0 %v279_v1  ;;  %v34_v4 = vld [vmem:[%s473_s1 + $0x8] sm:$0xff]  ;;  %v327_v5 = vld [vmem:[#allocation2 + $0x18] sm:$0xff]  ;;  %v330_v6 = vld [vmem:[#allocation2 + $0x10] sm:$0xff]  ;;  %v280_v8 = vmov 1   ;;  %v281_v9 = vmov 125   ;;  %v282_v10 = vmov 2  }
  0x15   :  { %36 = vperm.xlu0 %219, %v33_v2   ;;  %58 = vperm.xlu1 %220, %v321_v3   ;;  %v332_v7 = vld [vmem:[#allocation2] sm:$0xff]  ;;  %s283_s0 = smov 127   ;;  %s284_s1 = smov 1   ;;  %v368_v27 = vand.u32 127, %v30_v24 }
  0x16   :  { %s285_s27 = smov 126   ;;  %s286_s28 = smov 2  }
  0x17   :  { %v32_v30 = vadd.s32 128, %v368_v27  ;;  %vm49_vm0 = vcmp.lt.s32.totalorder %v368_v27, 127  ;;  %vm119_vm1 = vcmp.lt.s32.totalorder %v368_v27, 126  ;;  %vm84_vm4 = vcmp.lt.s32.totalorder %v368_v27, 1  ;;  %s287_s29 = smov [#allocation5]  }
  0x18   :  { %vm89_vm5 = vcmp.eq.s32.totalorder %v368_v27, 0  ;;  %vm156_vm7 = vcmp.lt.s32.totalorder %v368_v27, 2  ;;  %vm173_vm8 = vcmp.eq.s32.totalorder %v368_v27, 1  ;;  %s194_s30 = sshll.u32 %s287_s29, 4  ;;  %s195_s30 = int_to_ptr.vmem [resolvable:$true] %s194_s30 }
  0x19   :  { %39 = vperm.xlu0 %219, %v34_v4   ;;  %63 = vperm.xlu1 %220, %v327_v5   ;;  %vm125_vm2 = vcmp.eq.s32.totalorder %v32_v30, 254  ;;  %vm55_vm3 = vcmp.eq.s32.totalorder %v32_v30, 255  ;;  %s249_s3 = scalar_lea.vmem %s195_s30, 512  ;;  %p254_p9 = scmp.lt.s32.totalorder %s195_s30, %s195_s30 }
  0x1a   :  { %p250_p8 = scmp.ne.s32.totalorder %s195_s30, %s249_s3  ;;  %p255_p10 = scmp.lt.s32.totalorder %s249_s3, %s249_s3 }
  0x1c   :  { %p256_p11 = por %p255_p10, %p254_p9 }
  0x1d   :  { %221 = vset.pattern.permute.xlu0 %v280_v8  ;;  %222 = vset.pattern.permute.xlu1 %v280_v8 }
  0x1e   :  { %98 = vperm.xlu1 %222, %v330_v6   ;;  %93 = vperm.xlu0 %221, %v332_v7   ;;  %p257_p12 = pnand %p256_p11, %p250_p8 }
  0x22   :  { %223 = vset.pattern.permute.xlu1 %v281_v9  ;;  %224 = vset.pattern.permute.xlu0 %v281_v9 }
  0x23   :  { %131 = vperm.xlu1 %223, %v321_v3   ;;  %135 = vperm.xlu0 %224, %v327_v5  }
  0x27   :  { %225 = vset.pattern.permute.xlu1 %v282_v10  ;;  %41 = vrot.lane.b32.xlu0 %v332_v7, %s283_s0 }
  0x28   :  { %162 = vperm.xlu1 %225, %v332_v7   ;;  %226 = vset.pattern.permute.xlu0 %v282_v10 }
  0x2b   :  { %45 = vrot.lane.b32.xlu0 %v321_v3, %s283_s0 }
  0x2c   :  { %166 = vperm.xlu1 %225, %v330_v6  }
  0x2f   :  { %76 = vrot.lane.b32.xlu0 %v332_v7, %s284_s1 }
  0x30   :  { %43 = vrot.lane.b32.xlu1 %v330_v6, %s283_s0 }
  0x33   :  { %80 = vrot.lane.b32.xlu0 %v321_v3, %s284_s1 }
  0x34   :  { %47 = vrot.lane.b32.xlu1 %v327_v5, %s283_s0 }
  0x37   :  { %111 = vrot.lane.b32.xlu0 %v332_v7, %s285_s27 }
  0x38   :  { %78 = vrot.lane.b32.xlu1 %v330_v6, %s284_s1 }
  0x3b   :  { %115 = vrot.lane.b32.xlu0 %v321_v3, %s285_s27 }
  0x3c   :  { %82 = vrot.lane.b32.xlu1 %v327_v5, %s284_s1 }
  0x3f   :  { %148 = vrot.lane.b32.xlu0 %v332_v7, %s286_s28 }
  0x40   :  { %113 = vrot.lane.b32.xlu1 %v330_v6, %s285_s27 }
  0x43   :  { %152 = vrot.lane.b32.xlu0 %v321_v3, %s286_s28 }
  0x44   :  { %117 = vrot.lane.b32.xlu1 %v327_v5, %s285_s27 }
  0x48   :  { %150 = vrot.lane.b32.xlu1 %v330_v6, %s286_s28 }
  0x4c   :  { %154 = vrot.lane.b32.xlu1 %v327_v5, %s286_s28 }
  0x94   :  { %v59_v11 = vpop.permute.xlu1 %58  ;;  %v356_v12 = vpop.permute.xlu0 %36 }
  0x95   :  { %vm70_vm6 = vcmp.eq.s32.totalorder %v356_v12, 1  ;;  %vm105_vm9 = vcmp.eq.s32.totalorder %v356_v12, 4294967295  ;;  %vm142_vm10 = vcmp.eq.s32.totalorder %v356_v12, 2  ;;  %vm179_vm11 = vcmp.eq.s32.totalorder %v356_v12, 4294967294 }
  0x98   :  { %v358_v13 = vpop.permute.xlu1 %63  ;;  %v360_v14 = vpop.permute.xlu0 %39 }
  0x99   :  { %vm71_vm12 = vcmp.eq.s32.totalorder %v360_v14, 1  ;;  %vm106_vm13 = vcmp.eq.s32.totalorder %v360_v14, 4294967295  ;;  %vm143_vm14 = vcmp.eq.s32.totalorder %v360_v14, 2  ;;  %vm180_vm15 = vcmp.eq.s32.totalorder %v360_v14, 4294967294 }
  0x9d   :  { %v362_v15 = vpop.permute.xlu1 %98  ;;  %v94_v16 = vpop.permute.xlu0 %93 }
  0xa2   :  { %v132_v17 = vpop.permute.xlu1 %131  ;;  %v364_v18 = vpop.permute.xlu0 %135 }
  0xa6   :  { %v42_v19 = vpop.permute.xlu0 %41 }
  0xa7   :  { %v163_v20 = vpop.permute.xlu1 %162 }
  0xaa   :  { %v46_v21 = vpop.permute.xlu0 %45 }
  0xab   :  { %v366_v22 = vpop.permute.xlu1 %166  ;;  %v52_v33 = vsel %vm49_vm0, %v46_v21, %v42_v19  ;;  %v50_v40 = vsel %vm49_vm0, %v42_v19, %v46_v21 }
  0xac   :  { %v67_v37 = vsel %vm55_vm3, %v59_v11, %v52_v33  ;;  %v72_v46 = vsel %vm70_vm6, %v50_v40, %v332_v7 }
  0xad   :  { %v73_v44 = vsel %vm70_vm6, %v67_v37, %v321_v3 }
  0xae   :  { %v77_v23 = vpop.permute.xlu0 %76 }
  0xaf   :  { %v44_v25 = vpop.permute.xlu1 %43 }
  0xb2   :  { %v81_v26 = vpop.permute.xlu0 %80 }
  0xb3   :  { %v48_v28 = vpop.permute.xlu1 %47  ;;  %v87_v38 = vsel %vm84_vm4, %v81_v26, %v77_v23  ;;  %v85_v41 = vsel %vm84_vm4, %v77_v23, %v81_v26 }
  0xb4   :  { %v101_v45 = vsel %vm89_vm5, %v94_v16, %v87_v38  ;;  %v108_v47 = vsel %vm105_vm9, %v85_v41, %v73_v44  ;;  %v53_v50 = vsel %vm49_vm0, %v48_v28, %v44_v25  ;;  %v51_v3 = vsel %vm49_vm0, %v44_v25, %v48_v28 }
  0xb5   :  { %v107_v55 = vsel %vm105_vm9, %v101_v45, %v72_v46  ;;  %v69_v63 = vsel %vm55_vm3, %v358_v13, %v53_v50  ;;  %v74_v12 = vsel %vm71_vm12, %v51_v3, %v330_v6 }
  0xb6   :  { %v112_v29 = vpop.permute.xlu0 %111  ;;  %v75_v7 = vsel %vm71_vm12, %v69_v63, %v327_v5 }
  0xb7   :  { %v79_v31 = vpop.permute.xlu1 %78 }
  0xba   :  { %v116_v32 = vpop.permute.xlu0 %115 }
  0xbb   :  { %v122_v34 = vsel %vm119_vm1, %v116_v32, %v112_v29  ;;  %v83_v35 = vpop.permute.xlu1 %82  ;;  %v120_v48 = vsel %vm119_vm1, %v112_v29, %v116_v32 }
  0xbc   :  { %v127_v36 = vsel %vm125_vm2, %v59_v11, %v122_v34  ;;  %v144_v59 = vsel %vm142_vm10, %v120_v48, %v107_v55  ;;  %v88_v0 = vsel %vm84_vm4, %v83_v35, %v79_v31  ;;  %v86_v2 = vsel %vm84_vm4, %v79_v31, %v83_v35 }
  0xbd   :  { %v139_v43 = vsel %vm55_vm3, %v132_v17, %v127_v36  ;;  %v103_v8 = vsel %vm89_vm5, %v362_v15, %v88_v0  ;;  %v110_v9 = vsel %vm106_vm13, %v86_v2, %v75_v7 }
  0xbe   :  { %v149_v39 = vpop.permute.xlu0 %148  ;;  %v145_v51 = vsel %vm142_vm10, %v139_v43, %v108_v47  ;;  %v109_v17 = vsel %vm106_vm13, %v103_v8, %v74_v12 }
  0xbf   :  { %v114_v42 = vpop.permute.xlu1 %113 }
  0xc2   :  { %v153_v49 = vpop.permute.xlu0 %152 }
  0xc3   :  { %v157_v52 = vsel %vm156_vm7, %v149_v39, %v153_v49  ;;  %v159_v53 = vsel %vm156_vm7, %v153_v49, %v149_v39  ;;  %v118_v54 = vpop.permute.xlu1 %117 }
  0xc4   :  { %v169_v56 = vsel %vm89_vm5, %v163_v20, %v159_v53  ;;  %v182_v57 = vsel %vm179_vm11, %v157_v52, %v145_v51  ;;  %v123_v58 = vsel %vm119_vm1, %v118_v54, %v114_v42  ;;  %v121_v10 = vsel %vm119_vm1, %v114_v42, %v118_v54 }
  0xc5   :  { %v175_v60 = vsel %vm173_vm8, %v94_v16, %v169_v56  ;;  %186 = vst [vmem:[#allocation5 + $0x8] sm:$0xff] %v182_v57  ;;  %v129_v62 = vsel %vm125_vm2, %v358_v13, %v123_v58  ;;  %v146_v20 = vsel %vm143_vm14, %v121_v10, %v109_v17 }
  0xc6   :  { %v181_v61 = vsel %vm179_vm11, %v175_v60, %v144_v59  ;;  %v141_v4 = vsel %vm55_vm3, %v364_v18, %v129_v62 }
  0xc7   :  { %185 = vst [vmem:[#allocation5] sm:$0xff] %v181_v61  ;;  %v151_v1 = vpop.permute.xlu1 %150  ;;  %v147_v13 = vsel %vm143_vm14, %v141_v4, %v110_v9 }
  0xcb   :  { %v155_v11 = vpop.permute.xlu1 %154 }
  0xcc   :  { %v158_v5 = vsel %vm156_vm7, %v151_v1, %v155_v11  ;;  %v160_v16 = vsel %vm156_vm7, %v155_v11, %v151_v1 }
  0xcd   :  { %v171_v18 = vsel %vm89_vm5, %v366_v22, %v160_v16  ;;  %v184_v19 = vsel %vm180_vm15, %v158_v5, %v147_v13 }
  0xce   :  { %v177_v6 = vsel %vm173_vm8, %v362_v15, %v171_v18  ;;  %188 = vst [vmem:[#allocation5 + $0x18] sm:$0xff] %v184_v19 }
  0xcf   :  { %v183_v21 = vsel %vm180_vm15, %v177_v6, %v146_v20 }
  0xd0   :  { %187 = vst [vmem:[#allocation5 + $0x10] sm:$0xff] %v183_v21 }
  0xd1   :  { %260 = shalt.err (!%p257_p12)
}
  0xd2   :  { %s261_s6 = scalar_lea.hbm %s474_s2, 512 }
  0xd3   :  { %p262_p13 = scmp.ne.s32.totalorder %s474_s2, %s261_s6  ;;  %p265_p0 = scmp.lt.u32.totalorder %s261_s6, %s474_s2 }
  0xd5   :  { %p267_p1 = pnand %p265_p0, %p262_p13 }
  0xd7   :  { %270 = shalt.err (!%p267_p1)
}
  0xd8   :  { %200 = dma.vmem_to_hbm [thread:$0]  %s195_s30, 512, %s474_s2, [#allocation4], %s276_s19, %s276_s19, %s277_s20  }
  0xd9   :  { %273 = dma.done.wait [#allocation4], 512  }
  0xda   :  { %274 = vsyncadd [#allocation4], 4294966784 }
  0xdb   :  { %204 = vsyncpa [#allocation3], 1 }
  0xdc   :  { %205 = vsyncpa [#allocation4], 1 }

</bundles_post_ra>
